<compile_context>
chip_gen: v6e
topology: v6e:2x2x1
jax: 0.10.0
libtpu: 0.0.40
codegen_flags: <defaults>
</compile_context>

<pallas_src>
import math
import functools

import jax
import jax.numpy as jnp
from jax.experimental import pallas as pl
from jax.experimental.pallas import tpu as pltpu


# ----------------------------------------------------------------------------------
# Chip / tiling helpers
# ----------------------------------------------------------------------------------
def _device_kind():
    try:
        return jax.devices()[0].device_kind.lower()
    except Exception:
        return ""


def _physical_vmem_bytes():
    try:
        return int(pltpu.get_tpu_info().vmem_capacity_bytes)
    except Exception:
        # v7x has 64 MiB per TensorCore, v5e/v6e have 128 MiB.
        return (64 << 20) if "v7" in _device_kind() else (128 << 20)


def _vmem_limit(est_bytes):
    """Chip-aware scoped-VMEM limit: only raise above the 32 MiB default when needed,
    and always leave ~8 MiB headroom for compiler scratch."""
    default_scoped = 32 << 20
    if est_bytes <= default_scoped:
        return None
    return int(min(est_bytes, _physical_vmem_bytes() - (8 << 20)))


def _default_exp_dtype(compute_dtype):
    # bf16 exp uses the EUP bf16 path on v6e/v7x; v5e (and older) keep f32.
    if jnp.dtype(compute_dtype) == jnp.dtype(jnp.bfloat16):
        kind = _device_kind()
        if ("v6" in kind) or ("v7" in kind):
            return jnp.bfloat16
    return jnp.float32


def _default_tiles(C, csz):
    kind = _device_kind()
    small_vmem = "v7" in kind                       # 64 MiB VMEM -> smaller query tiles
    q_t = 256 if small_vmem else 512                # bigger TQ on v5e/v6e halves K/V re-reads
    kv_t = 512
    # QKV-projection M tile: large enough to amortize per-head weight re-streaming
    # (needs >= ~310 rows to be compute-bound), capped so the x block stays ~8 MiB.
    m_t = max(256, min(1024, ((8 << 20) // max(C * csz, 1)) // 8 * 8))
    return m_t, q_t, kv_t


def _pick_tile(dim, target):
    """Largest multiple-of-8 divisor of `dim` that is <= target; else the full dim."""
    if dim <= target:
        return dim
    t = (target // 8) * 8
    while t >= 8:
        if dim % t == 0:
            return t
        t -= 8
    return dim


# ----------------------------------------------------------------------------------
# Kernel A: per-head QKV projection.
#   grid = (n_m, H);  x (TM, C) resident over h;  per-head weights (C, hd) pipelined.
#   Three separate dots -> q/k/v refs written directly (lane-dense, no column slicing).
# ----------------------------------------------------------------------------------
def _qkv_proj_kernel(x_ref, wq_ref, wk_ref, wv_ref, bq_ref, bk_ref, bv_ref,
                     q_ref, k_ref, v_ref):
    x = x_ref[...]                                   # (TM, C) compute dtype
    q_ref[...] = (jnp.dot(x, wq_ref[...], preferred_element_type=jnp.float32)
                  + bq_ref[...]).astype(q_ref.dtype)
    k_ref[...] = (jnp.dot(x, wk_ref[...], preferred_element_type=jnp.float32)
                  + bk_ref[...]).astype(k_ref.dtype)
    v_ref[...] = (jnp.dot(x, wv_ref[...], preferred_element_type=jnp.float32)
                  + bv_ref[...]).astype(v_ref.dtype)


# ----------------------------------------------------------------------------------
# Kernel B: flash attention with in-kernel double-buffered KV loop + fused out-proj.
#   grid = (B, n_q, H)   ("parallel", "parallel", "arbitrary")
#   K/V arrive as (H, B*T, hd) HBM refs (memory_space=pl.ANY); per-KV-tile DMAs are
#   issued manually and overlapped with compute (slot 1-slot prefetch).
# ----------------------------------------------------------------------------------
def _flash_attn_kernel(q_ref, k_hbm, v_hbm, w_proj_ref, b_proj_ref, out_ref,
                       kbuf, vbuf, sem, m_scr, l_scr, acc_scr, out_acc,
                       *, seq_len, tq, tkv, compute_dtype, exp_dtype, approx_recip):
    b = pl.program_id(0)
    qi = pl.program_id(1)
    h = pl.program_id(2)
    n_head = pl.num_programs(2)

    q_lo = qi * tq                                   # first query row within this sequence
    n_kv = (q_lo + tq - 1) // tkv + 1                # causally-needed KV tiles only
    base_row = b * seq_len                           # batch offset in the flattened (B*T) axis

    def kv_copies(s, slot):
        row = pl.multiple_of(base_row + s * tkv, tkv)
        ck = pltpu.make_async_copy(k_hbm.at[h, pl.ds(row, tkv), :],
                                   kbuf.at[slot], sem.at[0, slot])
        cv = pltpu.make_async_copy(v_hbm.at[h, pl.ds(row, tkv), :],
                                   vbuf.at[slot], sem.at[1, slot])
        return ck, cv

    # Prime slot 0 (DMA overlaps with the scratch init + q load below).
    ck0, cv0 = kv_copies(0, 0)
    ck0.start()
    cv0.start()

    m_scr[...] = jnp.full_like(m_scr, -1e30)         # large finite negative (no -inf NaNs)
    l_scr[...] = jnp.zeros_like(l_scr)
    acc_scr[...] = jnp.zeros_like(acc_scr)

    q = q_ref[...]                                   # (TQ, hd), already scaled by 1/sqrt(hd)

    @pl.loop(0, n_kv)
    def _kv_step(s):
        slot = s & 1
        ck, cv = kv_copies(s, slot)
        ck.wait()
        cv.wait()

        @pl.when(s + 1 < n_kv)
        def _prefetch_next():
            nk, nv = kv_copies(s + 1, 1 - slot)
            nk.start()
            nv.start()

        k = kbuf[slot]                               # (TKV, hd)
        v = vbuf[slot]                               # (TKV, hd)
        # q @ k^T without materializing a transpose (NT dot_general), f32 accumulate.
        scores = jax.lax.dot_general(q, k, (((1,), (1,)), ((), ())),
                                     preferred_element_type=jnp.float32)   # (TQ, TKV)

        def update(sc):
            m_prev = m_scr[...]                      # (TQ, 1) f32
            m_new = jnp.maximum(m_prev, jnp.max(sc, axis=-1, keepdims=True))
            alpha = jnp.exp(m_prev - m_new)
            p = jnp.exp((sc - m_new).astype(exp_dtype))          # bf16 exp on v6e/v7x
            l_scr[...] = alpha * l_scr[...] + jnp.sum(p, axis=-1, keepdims=True,
                                                      dtype=jnp.float32)
            acc_scr[...] = alpha * acc_scr[...] + jnp.dot(
                p.astype(compute_dtype), v, preferred_element_type=jnp.float32)
            m_scr[...] = m_new

        k_lo = s * tkv
        diag = (k_lo + tkv - 1) > q_lo               # tile crosses the causal diagonal

        @pl.when(diag)
        def _masked_tile():
            row = q_lo + jax.lax.broadcasted_iota(jnp.int32, (tq, tkv), 0)
            col = k_lo + jax.lax.broadcasted_iota(jnp.int32, (tq, tkv), 1)
            update(jnp.where(col <= row, scores, -1e30))

        @pl.when(jnp.logical_not(diag))
        def _full_tile():
            update(scores)

    # Finalize this head and fold it into the fused output projection.
    y = acc_scr[...] * pl.reciprocal(l_scr[...], approx=approx_recip)      # (TQ, hd) f32
    contrib = jnp.dot(y.astype(compute_dtype), w_proj_ref[...],
                      preferred_element_type=jnp.float32)                  # (TQ, C) f32

    @pl.when(h == 0)
    def _first_head():
        out_acc[...] = contrib + b_proj_ref[...]

    @pl.when(h > 0)
    def _other_heads():
        out_acc[...] = out_acc[...] + contrib

    @pl.when(h == n_head - 1)
    def _write_out():
        out_ref[...] = out_acc[...].astype(out_ref.dtype)


# ----------------------------------------------------------------------------------
# Wrapper
# ----------------------------------------------------------------------------------
def causal_self_attention(x, w_attn, b_attn, w_proj, b_proj, *, n_head,
                          compute_dtype=jnp.bfloat16, exp_dtype=None,
                          q_tile=None, kv_tile=None, qkv_m_tile=None):
    """x: (B, T, C).  w_attn: (C, 3C), b_attn: (1, 3C), w_proj: (C, C), b_proj: (1, C)
    (weights stored as (in_features, out_features), i.e. PyTorch weight.T)."""
    B, T, C = x.shape
    assert C % n_head == 0
    H = n_head
    hd = C // H
    M = B * T
    scale = 1.0 / math.sqrt(hd)
    csz = jnp.dtype(compute_dtype).itemsize
    osz = jnp.dtype(x.dtype).itemsize

    if exp_dtype is None:
        exp_dtype = _default_exp_dtype(compute_dtype)
    d_m, d_q, d_kv = _default_tiles(C, csz)
    qkv_m_tile = d_m if qkv_m_tile is None else qkv_m_tile
    q_tile = d_q if q_tile is None else q_tile
    kv_tile = d_kv if kv_tile is None else kv_tile

    TM = _pick_tile(M, qkv_m_tile)
    TQ = _pick_tile(T, q_tile)
    TKV = _pick_tile(T, kv_tile)
    n_m, n_q = M // TM, T // TQ

    # --- wrapper-side layout plumbing (plain JAX, negligible) ---
    Wf = w_attn.astype(jnp.float32)
    bf = b_attn.reshape(-1).astype(jnp.float32)

    def head_major_w(w):                               # (C, C) -> (H, C, hd)
        return w.reshape(C, H, hd).transpose(1, 0, 2).astype(compute_dtype)

    def head_major_b(bb):                              # (C,) -> (H, 1, hd), kept f32
        return bb.reshape(H, 1, hd).astype(jnp.float32)

    # Fold the 1/sqrt(hd) scale into the Q weights / bias (zero runtime cost).
    w_q = head_major_w(Wf[:, 0 * C:1 * C] * scale)
    w_k = head_major_w(Wf[:, 1 * C:2 * C])
    w_v = head_major_w(Wf[:, 2 * C:3 * C])
    b_q = head_major_b(bf[0 * C:1 * C] * scale)
    b_k = head_major_b(bf[1 * C:2 * C])
    b_v = head_major_b(bf[2 * C:3 * C])

    w_proj_heads = w_proj.reshape(H, hd, C).astype(compute_dtype)   # (H, hd, C)
    b_proj_f32 = b_proj.reshape(1, C).astype(jnp.float32)
    x2 = x.reshape(M, C).astype(compute_dtype)

    # ---------------- Kernel A: QKV projection into head-major (H, B*T, hd) ----------
    est_a = (2 * TM * C * csz + 3 * 2 * C * hd * csz + 3 * 2 * 8 * hd * 4
             + 3 * 2 * TM * hd * csz + (1 << 20))
    q, k, v = pl.pallas_call(
        _qkv_proj_kernel,
        out_shape=[jax.ShapeDtypeStruct((H, M, hd), compute_dtype)] * 3,
        grid_spec=pltpu.PrefetchScalarGridSpec(
            num_scalar_prefetch=0,
            grid=(n_m, H),
            in_specs=[
                pl.BlockSpec((TM, C), lambda m, h: (m, 0)),          # x (resident over h)
                pl.BlockSpec((None, C, hd), lambda m, h: (h, 0, 0)),  # Wq per head
                pl.BlockSpec((None, C, hd), lambda m, h: (h, 0, 0)),  # Wk per head
                pl.BlockSpec((None, C, hd), lambda m, h: (h, 0, 0)),  # Wv per head
                pl.BlockSpec((None, 1, hd), lambda m, h: (h, 0, 0)),  # bq
                pl.BlockSpec((None, 1, hd), lambda m, h: (h, 0, 0)),  # bk
                pl.BlockSpec((None, 1, hd), lambda m, h: (h, 0, 0)),  # bv
            ],
            out_specs=[
                pl.BlockSpec((None, TM, hd), lambda m, h: (h, m, 0)),  # q
                pl.BlockSpec((None, TM, hd), lambda m, h: (h, m, 0)),  # k
                pl.BlockSpec((None, TM, hd), lambda m, h: (h, m, 0)),  # v
            ],
        ),
        compiler_params=pltpu.CompilerParams(
            dimension_semantics=("parallel", "parallel"),
            vmem_limit_bytes=_vmem_limit(est_a)),
    )(x2, w_q, w_k, w_v, b_q, b_k, b_v)

    # ---------------- Kernel B: flash attention + fused output projection -------------
    est_b = (2 * TQ * hd * csz + 2 * 2 * TKV * hd * csz + 2 * hd * C * csz
             + 2 * 8 * C * 4 + 2 * TQ * C * osz + TQ * C * 4
             + TQ * hd * 4 + 2 * TQ * 4 + (1 << 20))
    flash_kernel = functools.partial(
        _flash_attn_kernel, seq_len=T, tq=TQ, tkv=TKV,
        compute_dtype=compute_dtype, exp_dtype=exp_dtype,
        approx_recip=(jnp.dtype(compute_dtype) != jnp.dtype(jnp.float32)))

    out = pl.pallas_call(
        flash_kernel,
        out_shape=jax.ShapeDtypeStruct((B, T, C), x.dtype),
        grid_spec=pltpu.PrefetchScalarGridSpec(
            num_scalar_prefetch=0,
            grid=(B, n_q, H),
            in_specs=[
                pl.BlockSpec((None, TQ, hd), lambda b, qi, h: (h, b * n_q + qi, 0)),  # q
                pl.BlockSpec(memory_space=pl.ANY),                                     # K (HBM)
                pl.BlockSpec(memory_space=pl.ANY),                                     # V (HBM)
                pl.BlockSpec((None, hd, C), lambda b, qi, h: (h, 0, 0)),               # W_proj head
                pl.BlockSpec((1, C), lambda b, qi, h: (0, 0)),                         # b_proj
            ],
            out_specs=pl.BlockSpec((None, TQ, C), lambda b, qi, h: (b, qi, 0)),
            scratch_shapes=[
                pltpu.VMEM((2, TKV, hd), compute_dtype),   # K double buffer
                pltpu.VMEM((2, TKV, hd), compute_dtype),   # V double buffer
                pltpu.SemaphoreType.DMA((2, 2)),           # [k/v, slot]
                pltpu.VMEM((TQ, 1), jnp.float32),          # running max m
                pltpu.VMEM((TQ, 1), jnp.float32),          # running sum l
                pltpu.VMEM((TQ, hd), jnp.float32),         # per-head accumulator
                pltpu.VMEM((TQ, C), jnp.float32),          # lane-dense output accumulator
            ]),
        compiler_params=pltpu.CompilerParams(
            dimension_semantics=("parallel", "parallel", "arbitrary"),
            vmem_limit_bytes=_vmem_limit(est_b)),
    )(q, k, v, w_proj_heads, b_proj_f32)
    return out


# ----------------------------------------------------------------------------------
# Pure-JAX reference (replicates the PyTorch forward)
# ----------------------------------------------------------------------------------
def _reference(x, w_attn, b_attn, w_proj, b_proj, n_head):
    B, T, C = x.shape
    hd = C // n_head
    qkv = x @ w_attn + b_attn[0]
    q, k, v = jnp.split(qkv, 3, axis=-1)

    def heads(t):
        return t.reshape(B, T, n_head, hd).transpose(0, 2, 1, 3)

    q, k, v = heads(q), heads(k), heads(v)
    scores = jnp.einsum("bhqd,bhkd->bhqk", q, k) / math.sqrt(hd)
    mask = jnp.tril(jnp.ones((T, T), dtype=bool))
    scores = jnp.where(mask, scores, -jnp.inf)
    p = jax.nn.softmax(scores, axis=-1)
    y = jnp.einsum("bhqk,bhkd->bhqd", p, v)
    y = y.transpose(0, 2, 1, 3).reshape(B, T, C)
    return y @ w_proj + b_proj[0]


if __name__ == "__main__":
    B, T, n_embd, n_head = 2, 8, 32, 4

    key = jax.random.PRNGKey(0)
    k_x, k_wa, k_ba, k_wp, k_bp = jax.random.split(key, 5)
    bound = 1.0 / math.sqrt(n_embd)

    x = jax.random.normal(k_x, (B, T, n_embd), dtype=jnp.float32)
    # Weights stored as (in_features, out_features)  (== PyTorch weight.T).
    w_attn = jax.random.uniform(k_wa, (n_embd, 3 * n_embd), jnp.float32, -bound, bound)
    b_attn = jax.random.uniform(k_ba, (1, 3 * n_embd), jnp.float32, -bound, bound)
    w_proj = jax.random.uniform(k_wp, (n_embd, n_embd), jnp.float32, -bound, bound)
    b_proj = jax.random.uniform(k_bp, (1, n_embd), jnp.float32, -bound, bound)

    ref = _reference(x, w_attn, b_attn, w_proj, b_proj, n_head)

    # Default fast path: bf16 MXU operands, f32 softmax / accumulation.
    out_bf16 = causal_self_attention(x, w_attn, b_attn, w_proj, b_proj, n_head=n_head)
    out_bf16 = jax.block_until_ready(out_bf16)
    assert out_bf16.shape == (B, T, n_embd)
    assert jnp.allclose(out_bf16, ref, atol=5e-2, rtol=5e-2), "bf16 mismatch vs reference"

    # Bit-tight f32 path exercising the same kernels.
    out_f32 = causal_self_attention(x, w_attn, b_attn, w_proj, b_proj,
                                    n_head=n_head, compute_dtype=jnp.float32)
    out_f32 = jax.block_until_ready(out_f32)
    assert jnp.allclose(out_f32, ref, atol=1e-5, rtol=1e-5), "f32 mismatch vs reference"

    print("KERNEL_OK")
</pallas_src>

<mosaic_0001>
module attributes {stable_mosaic.version = 11 : i64} {
  func.func @_qkv_proj_kernel(%arg0: i32, %arg1: i32, %arg2: memref<16x32xbf16, #tpu.memory_space<vmem>>, %arg3: memref<1x32x8xbf16, #tpu.memory_space<vmem>>, %arg4: memref<1x32x8xbf16, #tpu.memory_space<vmem>>, %arg5: memref<1x32x8xbf16, #tpu.memory_space<vmem>>, %arg6: memref<1x1x8xf32, #tpu.memory_space<vmem>>, %arg7: memref<1x1x8xf32, #tpu.memory_space<vmem>>, %arg8: memref<1x1x8xf32, #tpu.memory_space<vmem>>, %arg9: memref<1x16x8xbf16, #tpu.memory_space<vmem>>, %arg10: memref<1x16x8xbf16, #tpu.memory_space<vmem>>, %arg11: memref<1x16x8xbf16, #tpu.memory_space<vmem>>) attributes {dimension_semantics = [#tpu.dimension_semantics<parallel>, #tpu.dimension_semantics<parallel>], iteration_bounds = array<i64: 1, 4>, scalar_prefetch = 0 : i64, scratch_operands = 0 : i64, tpu.core_type = #tpu.core_type<tc>, window_params = [{transform_indices = @transform_0, window_bounds = array<i64: 16, 32>}, {transform_indices = @transform_1, window_bounds = array<i64: 1, 32, 8>}, {transform_indices = @transform_2, window_bounds = array<i64: 1, 32, 8>}, {transform_indices = @transform_3, window_bounds = array<i64: 1, 32, 8>}, {transform_indices = @transform_4, window_bounds = array<i64: 1, 1, 8>}, {transform_indices = @transform_5, window_bounds = array<i64: 1, 1, 8>}, {transform_indices = @transform_6, window_bounds = array<i64: 1, 1, 8>}, {transform_indices = @transform_7, window_bounds = array<i64: 1, 16, 8>}, {transform_indices = @transform_8, window_bounds = array<i64: 1, 16, 8>}, {transform_indices = @transform_9, window_bounds = array<i64: 1, 16, 8>}]} {
    %c0 = arith.constant 0 : index
    %c0_0 = arith.constant 0 : index
    %0 = vector.load %arg2[%c0, %c0_0] : memref<16x32xbf16, #tpu.memory_space<vmem>>, vector<16x32xbf16>
    %c0_1 = arith.constant 0 : index
    %c0_2 = arith.constant 0 : index
    %c0_3 = arith.constant 0 : index
    %1 = vector.load %arg3[%c0_1, %c0_2, %c0_3] : memref<1x32x8xbf16, #tpu.memory_space<vmem>>, vector<1x32x8xbf16>
    %2 = vector.shape_cast %1 : vector<1x32x8xbf16> to vector<32x8xbf16>
    %cst = arith.constant dense<0.000000e+00> : vector<16x8xf32>
    %3 = tpu.matmul %0, %2, %cst {dimension_numbers = #tpu.dot_dimension_numbers<[1], [0], [0], [1], [0, 0, 1, 1], [], []>} : vector<16x32xbf16>, vector<32x8xbf16>, vector<16x8xf32> -> vector<16x8xf32>
    %c0_4 = arith.constant 0 : index
    %c0_5 = arith.constant 0 : index
    %c0_6 = arith.constant 0 : index
    %4 = vector.load %arg6[%c0_4, %c0_5, %c0_6] : memref<1x1x8xf32, #tpu.memory_space<vmem>>, vector<1x1x8xf32>
    %5 = vector.shape_cast %4 : vector<1x1x8xf32> to vector<1x8xf32>
    %6 = vector.broadcast %5 : vector<1x8xf32> to vector<16x8xf32>
    %7 = arith.addf %3, %6 : vector<16x8xf32>
    %8 = arith.truncf %7 : vector<16x8xf32> to vector<16x8xbf16>
    %c0_7 = arith.constant 0 : index
    %c0_8 = arith.constant 0 : index
    %c0_9 = arith.constant 0 : index
    %9 = vector.load %arg9[%c0_7, %c0_8, %c0_9] : memref<1x16x8xbf16, #tpu.memory_space<vmem>>, vector<1x16x8xbf16>
    %10 = vector.shape_cast %9 : vector<1x16x8xbf16> to vector<16x8xbf16>
    %11 = vector.shape_cast %8 : vector<16x8xbf16> to vector<1x16x8xbf16>
    tpu.vector_store %arg9[%c0_7, %c0_8, %c0_9], %11 {strides = array<i32>} : memref<1x16x8xbf16, #tpu.memory_space<vmem>>, vector<1x16x8xbf16>,
    %c0_10 = arith.constant 0 : index
    %c0_11 = arith.constant 0 : index
    %c0_12 = arith.constant 0 : index
    %12 = vector.load %arg4[%c0_10, %c0_11, %c0_12] : memref<1x32x8xbf16, #tpu.memory_space<vmem>>, vector<1x32x8xbf16>
    %13 = vector.shape_cast %12 : vector<1x32x8xbf16> to vector<32x8xbf16>
    %cst_13 = arith.constant dense<0.000000e+00> : vector<16x8xf32>
    %14 = tpu.matmul %0, %13, %cst_13 {dimension_numbers = #tpu.dot_dimension_numbers<[1], [0], [0], [1], [0, 0, 1, 1], [], []>} : vector<16x32xbf16>, vector<32x8xbf16>, vector<16x8xf32> -> vector<16x8xf32>
    %c0_14 = arith.constant 0 : index
    %c0_15 = arith.constant 0 : index
    %c0_16 = arith.constant 0 : index
    %15 = vector.load %arg7[%c0_14, %c0_15, %c0_16] : memref<1x1x8xf32, #tpu.memory_space<vmem>>, vector<1x1x8xf32>
    %16 = vector.shape_cast %15 : vector<1x1x8xf32> to vector<1x8xf32>
    %17 = vector.broadcast %16 : vector<1x8xf32> to vector<16x8xf32>
    %18 = arith.addf %14, %17 : vector<16x8xf32>
    %19 = arith.truncf %18 : vector<16x8xf32> to vector<16x8xbf16>
    %c0_17 = arith.constant 0 : index
    %c0_18 = arith.constant 0 : index
    %c0_19 = arith.constant 0 : index
    %20 = vector.load %arg10[%c0_17, %c0_18, %c0_19] : memref<1x16x8xbf16, #tpu.memory_space<vmem>>, vector<1x16x8xbf16>
    %21 = vector.shape_cast %20 : vector<1x16x8xbf16> to vector<16x8xbf16>
    %22 = vector.shape_cast %19 : vector<16x8xbf16> to vector<1x16x8xbf16>
    tpu.vector_store %arg10[%c0_17, %c0_18, %c0_19], %22 {strides = array<i32>} : memref<1x16x8xbf16, #tpu.memory_space<vmem>>, vector<1x16x8xbf16>,
    %c0_20 = arith.constant 0 : index
    %c0_21 = arith.constant 0 : index
    %c0_22 = arith.constant 0 : index
    %23 = vector.load %arg5[%c0_20, %c0_21, %c0_22] : memref<1x32x8xbf16, #tpu.memory_space<vmem>>, vector<1x32x8xbf16>
    %24 = vector.shape_cast %23 : vector<1x32x8xbf16> to vector<32x8xbf16>
    %cst_23 = arith.constant dense<0.000000e+00> : vector<16x8xf32>
    %25 = tpu.matmul %0, %24, %cst_23 {dimension_numbers = #tpu.dot_dimension_numbers<[1], [0], [0], [1], [0, 0, 1, 1], [], []>} : vector<16x32xbf16>, vector<32x8xbf16>, vector<16x8xf32> -> vector<16x8xf32>
    %c0_24 = arith.constant 0 : index
    %c0_25 = arith.constant 0 : index
    %c0_26 = arith.constant 0 : index
    %26 = vector.load %arg8[%c0_24, %c0_25, %c0_26] : memref<1x1x8xf32, #tpu.memory_space<vmem>>, vector<1x1x8xf32>
    %27 = vector.shape_cast %26 : vector<1x1x8xf32> to vector<1x8xf32>
    %28 = vector.broadcast %27 : vector<1x8xf32> to vector<16x8xf32>
    %29 = arith.addf %25, %28 : vector<16x8xf32>
    %30 = arith.truncf %29 : vector<16x8xf32> to vector<16x8xbf16>
    %c0_27 = arith.constant 0 : index
    %c0_28 = arith.constant 0 : index
    %c0_29 = arith.constant 0 : index
    %31 = vector.load %arg11[%c0_27, %c0_28, %c0_29] : memref<1x16x8xbf16, #tpu.memory_space<vmem>>, vector<1x16x8xbf16>
    %32 = vector.shape_cast %31 : vector<1x16x8xbf16> to vector<16x8xbf16>
    %33 = vector.shape_cast %30 : vector<16x8xbf16> to vector<1x16x8xbf16>
    tpu.vector_store %arg11[%c0_27, %c0_28, %c0_29], %33 {strides = array<i32>} : memref<1x16x8xbf16, #tpu.memory_space<vmem>>, vector<1x16x8xbf16>,
    return
  }
  func.func @transform_0(%arg0: i32, %arg1: i32) -> (i32, i32) {
    %c0_i32 = arith.constant 0 : i32
    %c0_i32_0 = arith.constant 0 : i32
    return %arg0, %c0_i32 : i32, i32
  }
  func.func @transform_1(%arg0: i32, %arg1: i32) -> (i32, i32, i32) {
    %c0_i32 = arith.constant 0 : i32
    %c0_i32_0 = arith.constant 0 : i32
    %c0_i32_1 = arith.constant 0 : i32
    return %arg1, %c0_i32, %c0_i32_0 : i32, i32, i32
  }
  func.func @transform_2(%arg0: i32, %arg1: i32) -> (i32, i32, i32) {
    %c0_i32 = arith.constant 0 : i32
    %c0_i32_0 = arith.constant 0 : i32
    %c0_i32_1 = arith.constant 0 : i32
    return %arg1, %c0_i32, %c0_i32_0 : i32, i32, i32
  }
  func.func @transform_3(%arg0: i32, %arg1: i32) -> (i32, i32, i32) {
    %c0_i32 = arith.constant 0 : i32
    %c0_i32_0 = arith.constant 0 : i32
    %c0_i32_1 = arith.constant 0 : i32
    return %arg1, %c0_i32, %c0_i32_0 : i32, i32, i32
  }
  func.func @transform_4(%arg0: i32, %arg1: i32) -> (i32, i32, i32) {
    %c0_i32 = arith.constant 0 : i32
    %c0_i32_0 = arith.constant 0 : i32
    %c0_i32_1 = arith.constant 0 : i32
    return %arg1, %c0_i32, %c0_i32_0 : i32, i32, i32
  }
  func.func @transform_5(%arg0: i32, %arg1: i32) -> (i32, i32, i32) {
    %c0_i32 = arith.constant 0 : i32
    %c0_i32_0 = arith.constant 0 : i32
    %c0_i32_1 = arith.constant 0 : i32
    return %arg1, %c0_i32, %c0_i32_0 : i32, i32, i32
  }
  func.func @transform_6(%arg0: i32, %arg1: i32) -> (i32, i32, i32) {
    %c0_i32 = arith.constant 0 : i32
    %c0_i32_0 = arith.constant 0 : i32
    %c0_i32_1 = arith.constant 0 : i32
    return %arg1, %c0_i32, %c0_i32_0 : i32, i32, i32
  }
  func.func @transform_7(%arg0: i32, %arg1: i32) -> (i32, i32, i32) {
    %c0_i32 = arith.constant 0 : i32
    %c0_i32_0 = arith.constant 0 : i32
    return %arg1, %arg0, %c0_i32 : i32, i32, i32
  }
  func.func @transform_8(%arg0: i32, %arg1: i32) -> (i32, i32, i32) {
    %c0_i32 = arith.constant 0 : i32
    %c0_i32_0 = arith.constant 0 : i32
    return %arg1, %arg0, %c0_i32 : i32, i32, i32
  }
  func.func @transform_9(%arg0: i32, %arg1: i32) -> (i32, i32, i32) {
    %c0_i32 = arith.constant 0 : i32
    %c0_i32_0 = arith.constant 0 : i32
    return %arg1, %arg0, %c0_i32 : i32, i32, i32
  }
}

</mosaic_0001>

<bundles_post_ra>
// kernel: tpu_custom_call.1
= control target key start
LH: loop header
LB: loop body
LE: loop exit
PB: predicated region body
PF: predicated region fallthrough
CT: control target
= control target key end

     0   :  { %s1182_s30 = smov 0   ;;  %s1184_s10 = smov 0   ;;  %s1260_s0 = inlined_call_operand.vmem [shape: bf16[16,32], index: 0, kind: input, shape index: {}]   ;;  %s1261_s1 = inlined_call_operand.vmem [shape: bf16[4,32,8], index: 1, kind: input, shape index: {}]   ;;  %s1262_s2 = inlined_call_operand.vmem [shape: bf16[4,32,8], index: 2, kind: input, shape index: {}]   ;;  %s1263_s3 = inlined_call_operand.vmem [shape: bf16[4,32,8], index: 3, kind: input, shape index: {}]   ;;  %s1264_s4 = inlined_call_operand.vmem [shape: f32[4,1,8], index: 4, kind: input, shape index: {}]   ;;  %s1265_s5 = inlined_call_operand.vmem [shape: f32[4,1,8], index: 5, kind: input, shape index: {}]   ;;  %s1266_s6 = inlined_call_operand.vmem [shape: f32[4,1,8], index: 6, kind: input, shape index: {}]   ;;  %s1267_s7 = inlined_call_operand.vmem [shape: bf16[4,16,8], index: 7, kind: output, shape index: {0}]   ;;  %s1268_s8 = inlined_call_operand.vmem [shape: bf16[4,16,8], index: 8, kind: output, shape index: {1}]   ;;  %s1269_s9 = inlined_call_operand.vmem [shape: bf16[4,16,8], index: 9, kind: output, shape index: {2}]  }
   0x1   :  { %s1186_s11 = smov 0  }
   0x2 LB: > { %s29_s12 = sadd.s32 1, %s1124_s10  ;;  %p994_p0 = scmp.ge.s32.totalorder %s1128_s11, 1  ;;  %s1128_s11 = sphi %s1186_s11, %s20_s11   ;;  %s1124_s10 = sphi %s1184_s10, %s1271_s10   ;;  %s1120_s30 = sphi %s1182_s30, %s1270_s30  }
   0x3   : > { %p30_p1 = scmp.ge.s32.totalorder %s29_s12, 4  ;;  %p365_p2 = scmp.lt.s32.totalorder %s1128_s11, 5 }
   0x5   : > { %s1273_s12 = smov (%p30_p1, %s29_s12), 0  ;;  %p366_p3 = pnand %p994_p0, %p365_p2 }
   0x6   : > { %p453_p4 = scmp.lt.s32.totalorder (!%p366_p3), %s1120_s30, 3 }
   0x7   : > { %369 = sbr.rel (%p366_p3) target bundleno = 233 (0xe9), region = 48 }
   0xc   : > { %v1130_v0 = vmov 0.0   ;;  %s1275_s30 = smov (!%p453_p4, %s1120_s30), 3  ;;  %vm1131_vm0 = vmmov 0   ;;  %v1102_v5 = vld [vmem:[%s1260_s0] sm:$0xff]   ;;  %vm538_vm1 = vcmask 261120   ;;  %vm591_vm2 = vcmask 60416  }
   0xd   : > { %1049 = vmatprep.subr.bf16.mxu0 %v1130_v0  ;;  %1057 = vmatprep.subr.bf16.mxu1 %v1130_v0  ;;  %s1028_s13 = sshll.u32 %s1275_s30, 4  ;;  %s470_s27 = scalar_lea.vmem %s1264_s4, %s1275_s30 }
   0xe   : > { %1053 = vmatprep.mubr.msk.bf16.mxu0 %vm1131_vm0, %v1130_v0  ;;  %1061 = vmatprep.mubr.msk.bf16.mxu1 %vm1131_vm0, %v1130_v0  ;;  %s457_s16 = scalar_lea.vmem %s1261_s1, %s1028_s13  ;;  %s462_s19 = scalar_lea.vmem %s1262_s2, %s1028_s13  ;;  %v1007_v8 = vld [vmem:[%s470_s27] ss:$0 sm:$0xff] }
   0xf   : > { %v1099_v1 = vld [vmem:[%s457_s16 + $0x8] sm:$0xff]   ;;  %v1101_v3 = vld [vmem:[%s457_s16] sm:$0xff]   ;;  %s467_s22 = scalar_lea.vmem %s1263_s3, %s1028_s13  ;;  %s473_s13 = scalar_lea.vmem %s1265_s5, %s1275_s30 }
  0x10   : > { %v1100_v2 = vld [vmem:[%s462_s19 + $0x8] sm:$0xff]   ;;  %1050 = vmatpush3.bf16.msra.mxu0 %v1099_v1  ;;  %v1103_v4 = vld [vmem:[%s462_s19] sm:$0xff]   ;;  %s1227_s14 = sshll.u32 %s1275_s30, 3  ;;  %s476_s23 = scalar_lea.vmem %s1266_s6, %s1275_s30 }
  0x11   : > { %1051 = vmatprep.subr.bf16.mxu0 %v1130_v0  ;;  %1058 = vmatpush3.bf16.msra.mxu1 %v1100_v2  ;;  %v1104_v6 = vld [vmem:[%s467_s22 + $0x8] sm:$0xff]   ;;  %v1105_v7 = vld [vmem:[%s467_s22] sm:$0xff]   ;;  %s485_s17 = scalar_lea.vmem %s1267_s7, %s1227_s14  ;;  %s495_s20 = scalar_lea.vmem %s1268_s8, %s1227_s14 }
  0x12   : > { %1059 = vmatprep.subr.bf16.mxu1 %v1130_v0  ;;  %v1014_v9 = vld [vmem:[%s473_s13] ss:$0 sm:$0xff]  ;;  %s505_s25 = scalar_lea.vmem %s1269_s9, %s1227_s14 }
  0x13   : > { %v1020_v23 = vld [vmem:[%s476_s23] ss:$0 sm:$0xff] }
  0x14   : > { %1052 = vmatpush3.bf16.msra.mxu0 %v1101_v3 }
  0x15   : > { %1060 = vmatpush3.bf16.msra.mxu1 %v1103_v4  ;;  %1065 = vmatprep.subr.bf16.mxu0 %v1130_v0 }
  0x17   : > { %1054 = vmatmul.mubr.msk.bf16.vlgmr.msra.gmra.mxu0 %vm538_vm1, %v1102_v5 }
  0x18   : > { %1066 = vmatpush3.bf16.msra.mxu0 %v1104_v6  ;;  %1062 = vmatmul.mubr.msk.bf16.vlgmr.msra.gmra.mxu1 %vm538_vm1, %v1102_v5 }
  0x19   : > { %1067 = vmatprep.subr.bf16.mxu0 %v1130_v0  ;;  %1069 = vmatprep.mubr.msk.bf16.mxu0 %vm1131_vm0, %v1130_v0 }
  0x1c   : > { %1068 = vmatpush3.bf16.msra.mxu0 %v1105_v7 }
  0x1f   : > { %1070 = vmatmul.mubr.msk.bf16.vlgmr.msra.gmra.mxu0 %vm538_vm1, %v1102_v5 }
  0xd7   : > { %v576_v10 = vpop.f32.mrf.mxu0 }
  0xd8   : > { %v577_v11 = vadd.f32 %v1007_v8, %v576_v10  ;;  %v651_v12 = vpop.f32.mrf.mxu1 }
  0xd9   : > { %v1055_v13 = vpop.f32.mrf.mxu0  ;;  %v652_v14 = vadd.f32 %v1014_v9, %v651_v12 }
  0xda   : > { %v1034_v15 = vpack.c.bf16 %v577_v11, %v577_v11  ;;  %v1063_v16 = vpop.f32.mrf.mxu1 }
  0xdb   : > { %v1036_v17 = vpack.c.bf16 %v652_v14, %v652_v14  ;;  %v579_v18 = vpop.f32.mrf.mxu0 }
  0xdc   : > { %592 = vst.msk [vmem:[%s485_s17] sm:$0xf] %vm591_vm2, %v1034_v15  ;;  %v580_v19 = vadd.f32 %v1007_v8, %v579_v18  ;;  %v654_v20 = vpop.f32.mrf.mxu1 }
  0xdd   : > { %666 = vst.msk [vmem:[%s495_s20] sm:$0xf] %vm591_vm2, %v1036_v17  ;;  %v1056_v21 = vpop.f32.mrf.mxu0  ;;  %v655_v22 = vadd.f32 %v1014_v9, %v654_v20 }
  0xde   : > { %v1035_v24 = vpack.c.bf16 %v580_v19, %v580_v19  ;;  %v1064_v25 = vpop.f32.mrf.mxu1 }
  0xdf   : > { %v1037_v26 = vpack.c.bf16 %v655_v22, %v655_v22  ;;  %v725_v27 = vpop.f32.mrf.mxu0 }
  0xe0   : > { %593 = vst.msk [vmem:[%s485_s17 + $0x4] sm:$0xf] %vm591_vm2, %v1035_v24  ;;  %v726_v28 = vadd.f32 %v1020_v23, %v725_v27 }
  0xe1   : > { %667 = vst.msk [vmem:[%s495_s20 + $0x4] sm:$0xf] %vm591_vm2, %v1037_v26  ;;  %v1071_v29 = vpop.f32.mrf.mxu0 }
  0xe2   : > { %v1038_v30 = vpack.c.bf16 %v726_v28, %v726_v28 }
  0xe3   : > { %v728_v31 = vpop.f32.mrf.mxu0 }
  0xe4   : > { %740 = vst.msk [vmem:[%s505_s25] sm:$0xf] %vm591_vm2, %v1038_v30  ;;  %v729_v32 = vadd.f32 %v1020_v23, %v728_v31 }
  0xe5   : > { %v1072_v33 = vpop.f32.mrf.mxu0 }
  0xe6   : > { %v1039_v34 = vpack.c.bf16 %v729_v32, %v729_v32 }
  0xe8   : > { %741 = vst.msk [vmem:[%s505_s25 + $0x4] sm:$0xf] %vm591_vm2, %v1039_v34 }
  0xe9 PF: > { %s20_s11 = sadd.s32 1, %s1128_s11   ;;  %s1270_s30 = smov %s1124_s10 }
  0xea   : > { %p17_p5 = scmp.ge.s32.totalorder %s20_s11, 6   ;;  %s1271_s10 = smov %s1273_s12 }
  0xec   :  { %19 = sbr.rel (!%p17_p5) target bundleno = 2 (0x2), region = 120 }

</bundles_post_ra>
